<compile_context>
chip_gen: v6e
topology: v6e:2x2x1
jax: 0.10.0
libtpu: 0.0.40
codegen_flags: <defaults>
</compile_context>

<pallas_src>
import jax
import jax.numpy as jnp
from jax.experimental import pallas as pl
from jax.experimental.pallas import tpu as pltpu


def _round_up(x: int, m: int) -> int:
    return ((x + m - 1) // m) * m


def _cdiv(x: int, y: int) -> int:
    return (x + y - 1) // y


def _skipgram_kernel(ctx_ref, emb_ref, w_ref, out_ref):
    """One (batch-tile, vocab-tile) step of the skip-gram forward.

    ctx_ref : VMEM (O, tile_b)   int32  context-word ids, batch on lanes
    emb_ref : VMEM (E, tile_b)   bf16   center-word embeddings, transposed
    w_ref   : VMEM (tile_v, E)   bf16   vocab tile of weights.T
    out_ref : VMEM (O, tile_b)   f32    logits accumulator -> log-sigmoid output
    """
    j = pl.program_id(1)
    tile_v = w_ref.shape[0]
    num_ctx = ctx_ref.shape[0]

    @pl.when(j == 0)
    def _init():
        out_ref[...] = jnp.zeros_like(out_ref)

    # Full scores for this vocab tile on the MXU: (tile_v, E) @ (E, tile_b) -> f32.
    scores = jnp.dot(w_ref[...], emb_ref[...], preferred_element_type=jnp.float32)

    # Vocab ids covered by this tile, laid out along sublanes.
    vids = jax.lax.broadcasted_iota(jnp.int32, scores.shape, 0) + j * tile_v

    # In-VMEM gather of the O context columns per batch element:
    # iota-compare + select + sublane reduce keeps batch on the lane axis throughout.
    ctx = ctx_ref[...]                                     # (O, tile_b) int32
    parts = []
    for o in range(num_ctx):                               # static, small (O = 8)
        hit = vids == ctx[o:o + 1, :]                      # (tile_v, tile_b)
        parts.append(jnp.sum(jnp.where(hit, scores, 0.0), axis=0, keepdims=True))
    out_ref[...] += jnp.concatenate(parts, axis=0)         # (O, tile_b)

    @pl.when(j == pl.num_programs(1) - 1)
    def _finalize():
        # Numerically-stable log-sigmoid, f32, on the lane-dense (O, tile_b) layout.
        x = out_ref[...]
        out_ref[...] = jnp.minimum(x, 0.0) - jnp.log1p(jnp.exp(-jnp.abs(x)))


def prepare_params(emb_table_f32, weights_f32, *, max_tile_v: int = 512):
    """One-time (init-time, NOT per-call) parameter prep:
       bf16 embedding table and the output weights stored transposed, vocab-padded."""
    emb_bf16 = jnp.asarray(emb_table_f32).astype(jnp.bfloat16)        # (V, E)
    w = jnp.asarray(weights_f32)                                      # (E, V)
    E, V = w.shape
    v_pad = _round_up(V, 128) if V <= max_tile_v else _round_up(V, max_tile_v)
    w_t = jnp.zeros((v_pad, E), dtype=jnp.bfloat16)
    w_t = w_t.at[:V].set(w.T.astype(jnp.bfloat16))                    # (V_pad, E)
    return emb_bf16, w_t


def skipgram_forward(center_word, context_words, emb_table_bf16, w_t_bf16,
                     *, max_tile_b: int = 1024, max_tile_v: int = 512):
    """center_word: (B,) int32, context_words: (B, O) int32,
       emb_table_bf16: (V, E) bf16, w_t_bf16: (V_pad, E) bf16 (= padded weights.T)."""
    B = int(center_word.shape[0])
    O = int(context_words.shape[1])
    V_pad, E = (int(s) for s in w_t_bf16.shape)
    assert V_pad % 128 == 0, "prepare_params pads the vocab dimension to 128"
    tile_v = V_pad if V_pad <= max_tile_v else max_tile_v
    assert V_pad % tile_v == 0, "prepare_params pads the vocab to a tile multiple"

    # Batch tiling: multiples of 128 (lane-dense output), and at least 2 batch tiles
    # whenever the padded batch exceeds one lane-tile so v7x's two TCs both get work.
    b_pad = _round_up(B, 128)
    n_bt = max(1, _cdiv(b_pad, max_tile_b))
    if b_pad > 128:
        n_bt = max(n_bt, 2)
    tile_b = _round_up(_cdiv(b_pad, n_bt), 128)
    b_pad = n_bt * tile_b

    center_p = center_word
    ctx_p = context_words
    if b_pad != B:
        center_p = jnp.pad(center_word, (0, b_pad - B))
        ctx_p = jnp.pad(context_words, ((0, b_pad - B), (0, 0)))

    # Small XLA glue: center-word embedding lookup (B*E bf16) + layout transposes so
    # the kernel sees batch on the lane axis everywhere.
    emb_t = emb_table_bf16[center_p].T                       # (E, b_pad) bf16
    ctx_t = ctx_p.T.astype(jnp.int32)                        # (O, b_pad) int32

    grid = (b_pad // tile_b, V_pad // tile_v)

    out_t = pl.pallas_call(
        _skipgram_kernel,
        out_shape=jax.ShapeDtypeStruct((O, b_pad), jnp.float32),
        grid_spec=pltpu.PrefetchScalarGridSpec(
            num_scalar_prefetch=0,
            grid=grid,
            in_specs=[
                pl.BlockSpec((O, tile_b), lambda i, j: (0, i)),   # context ids
                pl.BlockSpec((E, tile_b), lambda i, j: (0, i)),   # embeddings^T
                pl.BlockSpec((tile_v, E), lambda i, j: (j, 0)),   # weights^T vocab tile
            ],
            out_specs=pl.BlockSpec((O, tile_b), lambda i, j: (0, i)),
        ),
        compiler_params=pltpu.CompilerParams(
            dimension_semantics=("parallel", "arbitrary"),
        ),
    )(ctx_t, emb_t, w_t_bf16)

    log_sig = out_t.T[:B]                                    # (B, O) f32
    # TODO(synk): torch returns int64 true_y; JAX default config (x64 off) gives int32.
    true_y = jnp.zeros((B,), dtype=jnp.int32)
    return log_sig, true_y


if __name__ == "__main__":
    # Small, module-consistent shapes.
    V = 50          # vocab_len
    E = 64          # embedding_size (module default)
    B = 2           # batch of center words
    O = 8           # context / negative-sample words per center word

    key = jax.random.PRNGKey(0)
    k_emb, k_w, k_c, k_ctx = jax.random.split(key, 4)

    # Deterministic parameter init matching PyTorch defaults (N(0, 1) for both).
    emb_table = jax.random.normal(k_emb, (V, E), dtype=jnp.float32)
    weights = jax.random.normal(k_w, (E, V), dtype=jnp.float32)

    center_word = jax.random.randint(k_c, (B,), 0, V, dtype=jnp.int32)
    context_words = jax.random.randint(k_ctx, (B, O), 0, V, dtype=jnp.int32)

    emb_bf16, w_t_bf16 = prepare_params(emb_table, weights)
    log_sig, true_y = skipgram_forward(center_word, context_words, emb_bf16, w_t_bf16)
    jax.block_until_ready((log_sig, true_y))

    # Pure-JAX reference using the same bf16 operands (f32 math), mirroring the
    # kernel's MXU bf16 x bf16 -> f32 path.
    emb_ref_v = emb_bf16[center_word].astype(jnp.float32)               # (B, E)
    w_ref_v = w_t_bf16[:V].astype(jnp.float32)                           # (V, E)
    w_sel = w_ref_v[context_words]                                       # (B, O, E)
    logits_ref = jnp.einsum('be,boe->bo', emb_ref_v, w_sel,
                            precision=jax.lax.Precision.HIGHEST)
    ref = jax.nn.log_sigmoid(logits_ref)

    assert log_sig.shape == (B, O) and true_y.shape == (B,)
    assert jnp.allclose(log_sig, ref, atol=1e-3, rtol=1e-3), \
        float(jnp.max(jnp.abs(log_sig - ref)))
    assert jnp.all(true_y == 0)

    print("KERNEL_OK")
</pallas_src>

<mosaic_0001>
module attributes {stable_mosaic.version = 11 : i64} {
  func.func @_skipgram_kernel(%arg0: i32, %arg1: i32, %arg2: memref<8x128xi32, #tpu.memory_space<vmem>>, %arg3: memref<64x128xbf16, #tpu.memory_space<vmem>>, %arg4: memref<128x64xbf16, #tpu.memory_space<vmem>>, %arg5: memref<8x128xf32, #tpu.memory_space<vmem>>) attributes {dimension_semantics = [#tpu.dimension_semantics<parallel>, #tpu.dimension_semantics<arbitrary>], iteration_bounds = array<i64: 1, 1>, scalar_prefetch = 0 : i64, scratch_operands = 0 : i64, tpu.core_type = #tpu.core_type<tc>, window_params = [{transform_indices = @transform_0, window_bounds = array<i64: 8, 128>}, {transform_indices = @transform_1, window_bounds = array<i64: 64, 128>}, {transform_indices = @transform_2, window_bounds = array<i64: 128, 64>}, {transform_indices = @transform_3, window_bounds = array<i64: 8, 128>}]} {
    %c0_i32 = arith.constant 0 : i32
    %0 = arith.cmpi eq, %arg1, %c0_i32 : i32
    %1 = arith.extui %0 : i1 to i32
    %c0_i32_0 = arith.constant 0 : i32
    %2 = arith.cmpi ne, %1, %c0_i32_0 : i32
    scf.if %2 {
      %cst_28 = arith.constant 0.000000e+00 : f32
      %74 = vector.broadcast %cst_28 : f32 to vector<8x128xf32>
      %c0_29 = arith.constant 0 : index
      %c0_30 = arith.constant 0 : index
      %75 = vector.load %arg5[%c0_29, %c0_30] : memref<8x128xf32, #tpu.memory_space<vmem>>, vector<8x128xf32>
      tpu.vector_store %arg5[%c0_29, %c0_30], %74 {strides = array<i32>} : memref<8x128xf32, #tpu.memory_space<vmem>>, vector<8x128xf32>,
    } else {
    }
    %c0 = arith.constant 0 : index
    %c0_1 = arith.constant 0 : index
    %3 = vector.load %arg4[%c0, %c0_1] : memref<128x64xbf16, #tpu.memory_space<vmem>>, vector<128x64xbf16>
    %c0_2 = arith.constant 0 : index
    %c0_3 = arith.constant 0 : index
    %4 = vector.load %arg3[%c0_2, %c0_3] : memref<64x128xbf16, #tpu.memory_space<vmem>>, vector<64x128xbf16>
    %cst = arith.constant dense<0.000000e+00> : vector<128x128xf32>
    %5 = tpu.matmul %3, %4, %cst {dimension_numbers = #tpu.dot_dimension_numbers<[1], [0], [0], [1], [0, 0, 1, 1], [], []>} : vector<128x64xbf16>, vector<64x128xbf16>, vector<128x128xf32> -> vector<128x128xf32>
    %6 = tpu.iota {dimensions = array<i32: 0>} : vector<128x128xi32>
    %c128_i32 = arith.constant 128 : i32
    %7 = arith.muli %arg1, %c128_i32 : i32
    %8 = vector.broadcast %7 : i32 to vector<128x128xi32>
    %9 = arith.addi %6, %8 : vector<128x128xi32>
    %c0_4 = arith.constant 0 : index
    %c0_5 = arith.constant 0 : index
    %10 = vector.load %arg2[%c0_4, %c0_5] : memref<8x128xi32, #tpu.memory_space<vmem>>, vector<8x128xi32>
    %11 = vector.extract_strided_slice %10 {offsets = [0, 0], sizes = [1, 128], strides = [1, 1]} : vector<8x128xi32> to vector<1x128xi32>
    %12 = vector.broadcast %11 : vector<1x128xi32> to vector<128x128xi32>
    %13 = arith.cmpi eq, %9, %12 : vector<128x128xi32>
    %cst_6 = arith.constant 0.000000e+00 : f32
    %14 = vector.broadcast %cst_6 : f32 to vector<128x128xf32>
    %15 = arith.select %13, %5, %14 : vector<128x128xi1>, vector<128x128xf32>
    %cst_7 = arith.constant dense<0.000000e+00> : vector<128xf32>
    %16 = vector.multi_reduction <add>, %15, %cst_7 [0] : vector<128x128xf32> to vector<128xf32>
    %17 = vector.shape_cast %16 : vector<128xf32> to vector<1x128xf32>
    %18 = vector.extract_strided_slice %10 {offsets = [1, 0], sizes = [1, 128], strides = [1, 1]} : vector<8x128xi32> to vector<1x128xi32>
    %19 = vector.broadcast %18 : vector<1x128xi32> to vector<128x128xi32>
    %20 = arith.cmpi eq, %9, %19 : vector<128x128xi32>
    %cst_8 = arith.constant 0.000000e+00 : f32
    %21 = vector.broadcast %cst_8 : f32 to vector<128x128xf32>
    %22 = arith.select %20, %5, %21 : vector<128x128xi1>, vector<128x128xf32>
    %cst_9 = arith.constant dense<0.000000e+00> : vector<128xf32>
    %23 = vector.multi_reduction <add>, %22, %cst_9 [0] : vector<128x128xf32> to vector<128xf32>
    %24 = vector.shape_cast %23 : vector<128xf32> to vector<1x128xf32>
    %25 = vector.extract_strided_slice %10 {offsets = [2, 0], sizes = [1, 128], strides = [1, 1]} : vector<8x128xi32> to vector<1x128xi32>
    %26 = vector.broadcast %25 : vector<1x128xi32> to vector<128x128xi32>
    %27 = arith.cmpi eq, %9, %26 : vector<128x128xi32>
    %cst_10 = arith.constant 0.000000e+00 : f32
    %28 = vector.broadcast %cst_10 : f32 to vector<128x128xf32>
    %29 = arith.select %27, %5, %28 : vector<128x128xi1>, vector<128x128xf32>
    %cst_11 = arith.constant dense<0.000000e+00> : vector<128xf32>
    %30 = vector.multi_reduction <add>, %29, %cst_11 [0] : vector<128x128xf32> to vector<128xf32>
    %31 = vector.shape_cast %30 : vector<128xf32> to vector<1x128xf32>
    %32 = vector.extract_strided_slice %10 {offsets = [3, 0], sizes = [1, 128], strides = [1, 1]} : vector<8x128xi32> to vector<1x128xi32>
    %33 = vector.broadcast %32 : vector<1x128xi32> to vector<128x128xi32>
    %34 = arith.cmpi eq, %9, %33 : vector<128x128xi32>
    %cst_12 = arith.constant 0.000000e+00 : f32
    %35 = vector.broadcast %cst_12 : f32 to vector<128x128xf32>
    %36 = arith.select %34, %5, %35 : vector<128x128xi1>, vector<128x128xf32>
    %cst_13 = arith.constant dense<0.000000e+00> : vector<128xf32>
    %37 = vector.multi_reduction <add>, %36, %cst_13 [0] : vector<128x128xf32> to vector<128xf32>
    %38 = vector.shape_cast %37 : vector<128xf32> to vector<1x128xf32>
    %39 = vector.extract_strided_slice %10 {offsets = [4, 0], sizes = [1, 128], strides = [1, 1]} : vector<8x128xi32> to vector<1x128xi32>
    %40 = vector.broadcast %39 : vector<1x128xi32> to vector<128x128xi32>
    %41 = arith.cmpi eq, %9, %40 : vector<128x128xi32>
    %cst_14 = arith.constant 0.000000e+00 : f32
    %42 = vector.broadcast %cst_14 : f32 to vector<128x128xf32>
    %43 = arith.select %41, %5, %42 : vector<128x128xi1>, vector<128x128xf32>
    %cst_15 = arith.constant dense<0.000000e+00> : vector<128xf32>
    %44 = vector.multi_reduction <add>, %43, %cst_15 [0] : vector<128x128xf32> to vector<128xf32>
    %45 = vector.shape_cast %44 : vector<128xf32> to vector<1x128xf32>
    %46 = vector.extract_strided_slice %10 {offsets = [5, 0], sizes = [1, 128], strides = [1, 1]} : vector<8x128xi32> to vector<1x128xi32>
    %47 = vector.broadcast %46 : vector<1x128xi32> to vector<128x128xi32>
    %48 = arith.cmpi eq, %9, %47 : vector<128x128xi32>
    %cst_16 = arith.constant 0.000000e+00 : f32
    %49 = vector.broadcast %cst_16 : f32 to vector<128x128xf32>
    %50 = arith.select %48, %5, %49 : vector<128x128xi1>, vector<128x128xf32>
    %cst_17 = arith.constant dense<0.000000e+00> : vector<128xf32>
    %51 = vector.multi_reduction <add>, %50, %cst_17 [0] : vector<128x128xf32> to vector<128xf32>
    %52 = vector.shape_cast %51 : vector<128xf32> to vector<1x128xf32>
    %53 = vector.extract_strided_slice %10 {offsets = [6, 0], sizes = [1, 128], strides = [1, 1]} : vector<8x128xi32> to vector<1x128xi32>
    %54 = vector.broadcast %53 : vector<1x128xi32> to vector<128x128xi32>
    %55 = arith.cmpi eq, %9, %54 : vector<128x128xi32>
    %cst_18 = arith.constant 0.000000e+00 : f32
    %56 = vector.broadcast %cst_18 : f32 to vector<128x128xf32>
    %57 = arith.select %55, %5, %56 : vector<128x128xi1>, vector<128x128xf32>
    %cst_19 = arith.constant dense<0.000000e+00> : vector<128xf32>
    %58 = vector.multi_reduction <add>, %57, %cst_19 [0] : vector<128x128xf32> to vector<128xf32>
    %59 = vector.shape_cast %58 : vector<128xf32> to vector<1x128xf32>
    %60 = vector.extract_strided_slice %10 {offsets = [7, 0], sizes = [1, 128], strides = [1, 1]} : vector<8x128xi32> to vector<1x128xi32>
    %61 = vector.broadcast %60 : vector<1x128xi32> to vector<128x128xi32>
    %62 = arith.cmpi eq, %9, %61 : vector<128x128xi32>
    %cst_20 = arith.constant 0.000000e+00 : f32
    %63 = vector.broadcast %cst_20 : f32 to vector<128x128xf32>
    %64 = arith.select %62, %5, %63 : vector<128x128xi1>, vector<128x128xf32>
    %cst_21 = arith.constant dense<0.000000e+00> : vector<128xf32>
    %65 = vector.multi_reduction <add>, %64, %cst_21 [0] : vector<128x128xf32> to vector<128xf32>
    %66 = vector.shape_cast %65 : vector<128xf32> to vector<1x128xf32>
    %c0_22 = arith.constant 0 : index
    %c0_23 = arith.constant 0 : index
    %67 = vector.load %arg5[%c0_22, %c0_23] : memref<8x128xf32, #tpu.memory_space<vmem>>, vector<8x128xf32>
    %68 = tpu.concatenate %17, %24, %31, %38, %45, %52, %59, %66 in 0 : vector<1x128xf32>, vector<1x128xf32>, vector<1x128xf32>, vector<1x128xf32>, vector<1x128xf32>, vector<1x128xf32>, vector<1x128xf32>, vector<1x128xf32> -> vector<8x128xf32>
    %69 = arith.addf %67, %68 : vector<8x128xf32>
    %c0_24 = arith.constant 0 : index
    %c0_25 = arith.constant 0 : index
    %70 = vector.load %arg5[%c0_24, %c0_25] : memref<8x128xf32, #tpu.memory_space<vmem>>, vector<8x128xf32>
    tpu.vector_store %arg5[%c0_24, %c0_25], %69 {strides = array<i32>} : memref<8x128xf32, #tpu.memory_space<vmem>>, vector<8x128xf32>,
    %c0_i32_26 = arith.constant 0 : i32
    %71 = arith.cmpi eq, %arg1, %c0_i32_26 : i32
    %72 = arith.extui %71 : i1 to i32
    %c0_i32_27 = arith.constant 0 : i32
    %73 = arith.cmpi ne, %72, %c0_i32_27 : i32
    scf.if %73 {
      %c0_28 = arith.constant 0 : index
      %c0_29 = arith.constant 0 : index
      %74 = vector.load %arg5[%c0_28, %c0_29] : memref<8x128xf32, #tpu.memory_space<vmem>>, vector<8x128xf32>
      %cst_30 = arith.constant 0.000000e+00 : f32
      %75 = vector.broadcast %cst_30 : f32 to vector<8x128xf32>
      %76 = arith.minimumf %74, %75 : vector<8x128xf32>
      %77 = math.absf %74 : vector<8x128xf32>
      %cst_31 = arith.constant 0.000000e+00 : f32
      %78 = vector.broadcast %cst_31 : f32 to vector<8x128xf32>
      %79 = arith.subf %78, %77 : vector<8x128xf32>
      %80 = math.exp %79 : vector<8x128xf32>
      %81 = math.log1p %80 : vector<8x128xf32>
      %82 = arith.subf %76, %81 : vector<8x128xf32>
      %c0_32 = arith.constant 0 : index
      %c0_33 = arith.constant 0 : index
      %83 = vector.load %arg5[%c0_32, %c0_33] : memref<8x128xf32, #tpu.memory_space<vmem>>, vector<8x128xf32>
      tpu.vector_store %arg5[%c0_32, %c0_33], %82 {strides = array<i32>} : memref<8x128xf32, #tpu.memory_space<vmem>>, vector<8x128xf32>,
    } else {
    }
    return
  }
  func.func @transform_0(%arg0: i32, %arg1: i32) -> (i32, i32) {
    %c0_i32 = arith.constant 0 : i32
    %c0_i32_0 = arith.constant 0 : i32
    return %c0_i32, %arg0 : i32, i32
  }
  func.func @transform_1(%arg0: i32, %arg1: i32) -> (i32, i32) {
    %c0_i32 = arith.constant 0 : i32
    %c0_i32_0 = arith.constant 0 : i32
    return %c0_i32, %arg0 : i32, i32
  }
  func.func @transform_2(%arg0: i32, %arg1: i32) -> (i32, i32) {
    %c0_i32 = arith.constant 0 : i32
    %c0_i32_0 = arith.constant 0 : i32
    return %arg1, %c0_i32 : i32, i32
  }
  func.func @transform_3(%arg0: i32, %arg1: i32) -> (i32, i32) {
    %c0_i32 = arith.constant 0 : i32
    %c0_i32_0 = arith.constant 0 : i32
    return %c0_i32, %arg0 : i32, i32
  }
}

</mosaic_0001>

<bundles_post_ra>
// kernel: tpu_custom_call.1
= control target key start
LH: loop header
LB: loop body
LE: loop exit
PB: predicated region body
PF: predicated region fallthrough
CT: control target
= control target key end

     0   :  { %vm109_vm0 = vcmask 523264   ;;  %s1928_s0 = inlined_call_operand.vmem [shape: s32[8,128], index: 0, kind: input, shape index: {}]   ;;  %s1929_s1 = inlined_call_operand.vmem [shape: bf16[64,128], index: 1, kind: input, shape index: {}]   ;;  %s1930_s2 = inlined_call_operand.vmem [shape: bf16[128,64], index: 2, kind: input, shape index: {}]   ;;  %s1931_s3 = inlined_call_operand.hbm [shape: f32[8,128], index: 3, kind: output, shape index: {}]  }
   0x1   :  { %v840_v0 = vld [vmem:[%s1929_s1 + $0x18] sm:$0xff]   ;;  %v841_v1 = vld [vmem:[%s1929_s1 + $0x10] sm:$0xff]   ;;  %v842_v2 = vld [vmem:[%s1929_s1 + $0x8] sm:$0xff]  }
   0x2   :  { %806 = vmatprep.subr.bf16.mxu0 %v840_v0  ;;  %830 = vmatprep.subr.bf16.mxu1 %v840_v0  ;;  %v844_v3 = vld [vmem:[%s1930_s2] sm:$0xff]  }
   0x3   :  { %807 = vmatpush3.bf16.msra.mxu0 %v840_v0  ;;  %834 = vmatpush3.bf16.msra.mxu1 %v840_v0  ;;  %v843_v4 = vld [vmem:[%s1929_s1] sm:$0xff]  }
   0x4   :  { %808 = vmatprep.subr.bf16.mxu0 %v841_v1  ;;  %831 = vmatprep.subr.bf16.mxu1 %v841_v1  ;;  %v848_v5 = vld [vmem:[%s1930_s2 + $0x20] sm:$0xff]  }
   0x5   :  { %814 = vmatprep.mubr.msk.bf16.mxu0 %vm109_vm0, %v844_v3  ;;  %822 = vmatprep.mubr.msk.bf16.mxu1 %vm109_vm0, %v848_v5 }
   0x7   :  { %809 = vmatpush3.bf16.msra.mxu0 %v841_v1  ;;  %835 = vmatpush3.bf16.msra.mxu1 %v841_v1 }
   0x8   :  { %810 = vmatprep.subr.bf16.mxu0 %v842_v2  ;;  %832 = vmatprep.subr.bf16.mxu1 %v842_v2 }
   0xb   :  { %811 = vmatpush3.bf16.msra.mxu0 %v842_v2  ;;  %836 = vmatpush3.bf16.msra.mxu1 %v842_v2 }
   0xc   :  { %812 = vmatprep.subr.bf16.mxu0 %v843_v4  ;;  %833 = vmatprep.subr.bf16.mxu1 %v843_v4 }
   0xd   :  { %8 = vsyncpa [#allocation3], 0  ;;  %v845_v6 = vld [vmem:[%s1930_s2 + $0x8] sm:$0xff]   ;;  %v846_v8 = vld [vmem:[%s1930_s2 + $0x10] sm:$0xff]   ;;  %v231_v12 = vlaneseq }
   0xe   :  { %v849_v7 = vld [vmem:[%s1930_s2 + $0x28] sm:$0xff]   ;;  %v850_v9 = vld [vmem:[%s1930_s2 + $0x30] sm:$0xff]   ;;  %v847_v10 = vld [vmem:[%s1930_s2 + $0x18] sm:$0xff]  }
   0xf   :  { %813 = vmatpush3.bf16.msra.mxu0 %v843_v4  ;;  %837 = vmatpush3.bf16.msra.mxu1 %v843_v4  ;;  %v851_v11 = vld [vmem:[%s1930_s2 + $0x38] sm:$0xff]   ;;  %v943_v13 = vshrl.u32 %v231_v12, 7  ;;  %v266_v15 = vld [vmem:[%s1928_s0] sm:$0xff]  ;;  %s878_s0 = smov [#allocation2]  }
  0x10   :  { %s766_s2 = sshll.u32 %s878_s0, 4  ;;  %s767_s2 = int_to_ptr.vmem [resolvable:$true] %s766_s2 }
  0x11   :  { %v269_v14 = vsub.s32 0, %v943_v13  ;;  %v326_v16 = vsub.s32 1, %v943_v13  ;;  %v383_v17 = vsub.s32 2, %v943_v13  ;;  %v440_v18 = vsub.s32 3, %v943_v13  ;;  %s856_s10 = scalar_lea.vmem %s767_s2, 128  ;;  %p861_p1 = scmp.lt.s32.totalorder %s767_s2, %s767_s2 }
  0x12   :  { %815 = vmatmul.mubr.msk.bf16.vlgmr.msra.gmra.mxu0 %vm109_vm0, %v845_v6  ;;  %823 = vmatmul.mubr.msk.bf16.vlgmr.msra.gmra.mxu1 %vm109_vm0, %v849_v7  ;;  %v497_v19 = vsub.s32 4, %v943_v13  ;;  %v554_v20 = vsub.s32 5, %v943_v13  ;;  %v611_v21 = vsub.s32 6, %v943_v13  ;;  %v668_v22 = vsub.s32 7, %v943_v13  ;;  %p857_p0 = scmp.ne.s32.totalorder %s767_s2, %s856_s10  ;;  %p862_p2 = scmp.lt.s32.totalorder %s856_s10, %s856_s10 }
  0x13   :  { %818 = vmatprep.mubr.msk.bf16.mxu0 %vm109_vm0, %v846_v8  ;;  %826 = vmatprep.mubr.msk.bf16.mxu1 %vm109_vm0, %v850_v9  ;;  %v957_v23 = vadd.s32 16, %v943_v13  ;;  %v959_v24 = vrot.slane %v266_v15, %v269_v14  ;;  %v961_v25 = vrot.slane %v266_v15, %v326_v16  ;;  %v963_v26 = vrot.slane %v266_v15, %v383_v17 }
  0x14   :  { %v965_v27 = vrot.slane %v266_v15, %v440_v18  ;;  %v967_v28 = vrot.slane %v266_v15, %v497_v19  ;;  %v969_v29 = vrot.slane %v266_v15, %v554_v20  ;;  %v971_v30 = vrot.slane %v266_v15, %v611_v21  ;;  %p863_p3 = por %p862_p2, %p861_p1 }
  0x15   :  { %v973_v31 = vrot.slane %v266_v15, %v668_v22  ;;  %vm273_vm1 = vcmp.eq.s32.totalorder %v957_v23, %v959_v24  ;;  %vm330_vm2 = vcmp.eq.s32.totalorder %v957_v23, %v961_v25  ;;  %vm387_vm3 = vcmp.eq.s32.totalorder %v957_v23, %v963_v26 }
  0x16   :  { %vm444_vm4 = vcmp.eq.s32.totalorder %v957_v23, %v965_v27  ;;  %v984_v32 = vadd.s32 24, %v943_v13  ;;  %vm501_vm5 = vcmp.eq.s32.totalorder %v957_v23, %v967_v28  ;;  %vm558_vm6 = vcmp.eq.s32.totalorder %v957_v23, %v969_v29  ;;  %p864_p4 = pnand %p863_p3, %p857_p0 }
  0x17   :  { %vm615_vm7 = vcmp.eq.s32.totalorder %v957_v23, %v971_v30  ;;  %vm672_vm8 = vcmp.eq.s32.totalorder %v957_v23, %v973_v31  ;;  %vm271_vm9 = vcmp.eq.s32.totalorder %v943_v13, %v959_v24  ;;  %v1001_v33 = vadd.s32 8, %v943_v13 }
  0x18   :  { %v1026_v34 = vadd.s32 80, %v943_v13  ;;  %v1049_v35 = vadd.s32 56, %v943_v13  ;;  %v1052_v36 = vadd.s32 64, %v943_v13  ;;  %v1055_v37 = vadd.s32 32, %v943_v13 }
  0x19   :  { %vm329_vm13 = vcmp.eq.s32.totalorder %v1001_v33, %v961_v25  ;;  %vm386_vm14 = vcmp.eq.s32.totalorder %v1001_v33, %v963_v26  ;;  %vm443_vm15 = vcmp.eq.s32.totalorder %v1001_v33, %v965_v27  ;;  %v1058_v38 = vadd.s32 40, %v943_v13 }
  0x1a   :  { %819 = vmatmul.mubr.msk.bf16.gmra.mxu0 %vm109_vm0, %v847_v10  ;;  %827 = vmatmul.mubr.msk.bf16.gmra.mxu1 %vm109_vm0, %v851_v11  ;;  %v1061_v39 = vadd.s32 48, %v943_v13  ;;  %v1068_v41 = vadd.s32 88, %v943_v13  ;;  %v1071_v42 = vadd.s32 72, %v943_v13  ;;  %v1074_v43 = vadd.s32 120, %v943_v13 }
  0x1b   :  { %v1077_v44 = vadd.s32 96, %v943_v13  ;;  %vm395_vm12 = vcmp.eq.s32.totalorder %v1026_v34, %v963_v26  ;;  %vm452_vm10 = vcmp.eq.s32.totalorder %v1026_v34, %v965_v27  ;;  %vm509_vm11 = vcmp.eq.s32.totalorder %v1026_v34, %v967_v28 }
  0x1c   :  { %vm566_vm0 = vcmp.eq.s32.totalorder %v1026_v34, %v969_v29  ;;  %v1098_v47 = vadd.s32 104, %v943_v13  ;;  %v1101_v48 = vadd.s32 112, %v943_v13 }
  0xd2   :  { %v816_v40 = vpop.f32.mrf.mxu0 }
  0xd3   :  { %v1082_v45 = vsel %vm273_vm1, %v816_v40, 0.0  ;;  %v1087_v46 = vsel %vm330_vm2, %v816_v40, 0.0  ;;  %v1106_v49 = vsel %vm387_vm3, %v816_v40, 0.0  ;;  %v1111_v50 = vsel %vm444_vm4, %v816_v40, 0.0 }
  0xd4   :  { %v1116_v51 = vsel %vm501_vm5, %v816_v40, 0.0  ;;  %v1121_v52 = vsel %vm558_vm6, %v816_v40, 0.0  ;;  %v168_v53 = vpop.f32.mrf.mxu0  ;;  %vm623_vm1 = vcmp.eq.s32.totalorder %v1026_v34, %v971_v30  ;;  %vm680_vm2 = vcmp.eq.s32.totalorder %v1026_v34, %v973_v31 }
  0xd5   :  { %v1134_v54 = vsel %vm615_vm7, %v816_v40, 0.0  ;;  %v1139_v55 = vsel %vm672_vm8, %v816_v40, 0.0  ;;  %v287_v56 = vsel %vm271_vm9, %v168_v53, 0.0  ;;  %vm1932_vm5 = vcmp.eq.s32.totalorder %v943_v13, %v961_v25 }
  0xd6   :  { %v344_v57 = vsel %vm1932_vm5, %v168_v53, 0.0  ;;  %vm392_vm6 = vcmp.eq.s32.totalorder %v1049_v35, %v963_v26  ;;  %vm1933_vm3 = vcmp.eq.s32.totalorder %v943_v13, %v963_v26  ;;  %vm1934_vm9 = vcmp.eq.s32.totalorder %v943_v13, %v965_v27  ;;  %v817_v62 = vpop.f32.mrf.mxu0 }
  0xd7   :  { %v401_v58 = vsel %vm1933_vm3, %v168_v53, 0.0  ;;  %v458_v59 = vsel %vm1934_vm9, %v168_v53, 0.0  ;;  %vm1935_vm5 = vcmp.eq.s32.totalorder %v943_v13, %v967_v28  ;;  %vm1936_vm7 = vcmp.eq.s32.totalorder %v943_v13, %v969_v29 }
  0xd8   :  { %v515_v60 = vsel %vm1935_vm5, %v168_v53, 0.0  ;;  %v572_v61 = vsel %vm1936_vm7, %v168_v53, 0.0  ;;  %vm1937_vm5 = vcmp.eq.s32.totalorder %v943_v13, %v971_v30  ;;  %vm1938_vm7 = vcmp.eq.s32.totalorder %v943_v13, %v973_v31  ;;  %v171_v7 = vpop.f32.mrf.mxu0 }
  0xd9   :  { %v629_v63 = vsel %vm1937_vm5, %v168_v53, 0.0  ;;  %v686_v0 = vsel %vm1938_vm7, %v168_v53, 0.0  ;;  %vm1939_vm8 = vcmp.eq.s32.totalorder %v984_v32, %v959_v24  ;;  %vm1940_vm4 = vcmp.eq.s32.totalorder %v984_v32, %v961_v25  ;;  %v824_v53 = vpop.f32.mrf.mxu1 }
  0xda   :  { %v1184_v1 = vsel %vm1939_vm8, %v817_v62, 0.0  ;;  %v1189_v2 = vsel %vm1940_vm4, %v817_v62, 0.0  ;;  %vm1941_vm8 = vcmp.eq.s32.totalorder %v984_v32, %v963_v26  ;;  %vm1942_vm4 = vcmp.eq.s32.totalorder %v984_v32, %v965_v27  ;;  %v1253_v16 = vpop.f32.mrf.mxu0 }
  0xdb   :  { %v1202_v3 = vsel %vm1941_vm8, %v817_v62, 0.0  ;;  %v1207_v4 = vsel %vm1942_vm4, %v817_v62, 0.0  ;;  %vm1943_vm9 = vcmp.eq.s32.totalorder %v984_v32, %v967_v28  ;;  %vm1944_vm3 = vcmp.eq.s32.totalorder %v984_v32, %v969_v29 }
  0xdc   :  { %v1212_v5 = vsel %vm1943_vm9, %v817_v62, 0.0  ;;  %v1217_v6 = vsel %vm1944_vm3, %v817_v62, 0.0  ;;  %vm621_vm8 = vcmp.eq.s32.totalorder %v1052_v36, %v971_v30  ;;  %vm678_vm7 = vcmp.eq.s32.totalorder %v1052_v36, %v973_v31  ;;  %v1283_v40 = vpop.f32.mrf.mxu0 }
  0xdd   :  { %vm275_vm4 = vcmp.eq.s32.totalorder %v1055_v37, %v959_v24  ;;  %vm1945_vm5 = vcmp.eq.s32.totalorder %v1001_v33, %v959_v24  ;;  %v345_v9 = vsel %vm329_vm13, %v171_v7, 0.0  ;;  %v402_v10 = vsel %vm386_vm14, %v171_v7, 0.0 }
  0xde   :  { %v288_v8 = vsel %vm1945_vm5, %v171_v7, 0.0  ;;  %v459_v11 = vsel %vm443_vm15, %v171_v7, 0.0  ;;  %vm1946_vm13 = vcmp.eq.s32.totalorder %v984_v32, %v971_v30  ;;  %vm1947_vm14 = vcmp.eq.s32.totalorder %v984_v32, %v973_v31 }
  0xdf   :  { %v1246_v12 = vsel %vm1946_vm13, %v817_v62, 0.0  ;;  %v1251_v13 = vsel %vm1947_vm14, %v817_v62, 0.0  ;;  %v303_v14 = vadd.f32 %v288_v8, %v287_v56  ;;  %v360_v15 = vadd.f32 %v345_v9, %v344_v57 }
  0xe0   :  { %vm1948_vm13 = vcmp.eq.s32.totalorder %v1001_v33, %v967_v28  ;;  %vm1949_vm14 = vcmp.eq.s32.totalorder %v1001_v33, %v969_v29  ;;  %vm1950_vm3 = vcmp.eq.s32.totalorder %v1001_v33, %v971_v30  ;;  %vm1951_vm15 = vcmp.eq.s32.totalorder %v1001_v33, %v973_v31 }
  0xe1   :  { %v516_v17 = vsel %vm1948_vm13, %v171_v7, 0.0  ;;  %v573_v18 = vsel %vm1949_vm14, %v171_v7, 0.0  ;;  %v630_v19 = vsel %vm1950_vm3, %v171_v7, 0.0  ;;  %v687_v20 = vsel %vm1951_vm15, %v171_v7, 0.0 }
  0xe2   :  { %vm390_vm5 = vcmp.eq.s32.totalorder %v1058_v38, %v963_v26  ;;  %vm391_vm9 = vcmp.eq.s32.totalorder %v1061_v39, %v963_v26  ;;  %v417_v21 = vadd.f32 %v402_v10, %v401_v58  ;;  %v1277_v22 = vadd.f32 %v459_v11, %v458_v59 }
  0xe3   :  { %v1279_v23 = vadd.f32 %v516_v17, %v515_v60  ;;  %v1281_v32 = vadd.f32 %v573_v18, %v572_v61  ;;  %v1289_v33 = vadd.f32 %v630_v19, %v629_v63  ;;  %v1291_v56 = vadd.f32 %v687_v20, %v686_v0  ;;  %v821_v63 = vpop.f32.mrf.mxu0  ;;  %v200_v18 = vpop.f32.mrf.mxu1 }
  0xe4   :  { %vm1952_vm13 = vcmp.eq.s32.totalorder %v1026_v34, %v959_v24  ;;  %vm1954_vm14 = vcmp.eq.s32.totalorder %v1026_v34, %v961_v25  ;;  %vm448_vm3 = vcmp.eq.s32.totalorder %v1061_v39, %v965_v27  ;;  %vm503_vm15 = vcmp.eq.s32.totalorder %v1055_v37, %v967_v28 }
  0xe5   :  { %v1296_v57 = vsel %vm1952_vm13, %v824_v53, 0.0  ;;  %v1301_v58 = vsel %vm1954_vm14, %v824_v53, 0.0  ;;  %v1310_v59 = vsel %vm395_vm12, %v824_v53, 0.0  ;;  %v1315_v60 = vsel %vm452_vm10, %v824_v53, 0.0 }
  0xe6   :  { %1953 = vst [vmem:[#allocation5_spill] sm:$0xff] %v1296_v57  ;;  %1955 = vst [vmem:[#allocation6_spill] sm:$0xff] %v1301_v58  ;;  %v1320_v61 = vsel %vm509_vm11, %v824_v53, 0.0  ;;  %v1325_v62 = vsel %vm566_vm0, %v824_v53, 0.0  ;;  %vm504_vm12 = vcmp.eq.s32.totalorder %v1058_v38, %v967_v28  ;;  %v1332_v0 = vsel %vm623_vm1, %v824_v53, 0.0 }
  0xe7   :  { %1956 = vst [vmem:[#allocation7_spill] sm:$0xff] %v1310_v59  ;;  %1957 = vst [vmem:[#allocation8_spill] sm:$0xff] %v1315_v60  ;;  %v1337_v7 = vsel %vm680_vm2, %v824_v53, 0.0  ;;  %vm1962_vm10 = vcmp.eq.s32.totalorder %v1049_v35, %v959_v24  ;;  %vm1963_vm11 = vcmp.eq.s32.totalorder %v1049_v35, %v961_v25  ;;  %vm505_vm0 = vcmp.eq.s32.totalorder %v1061_v39, %v967_v28 }
  0xe8   :  { %1958 = vst [vmem:[#allocation9_spill] sm:$0xff] %v1320_v61  ;;  %1959 = vst [vmem:[#allocation10_spill] sm:$0xff] %v1325_v62  ;;  %v1342_v8 = vsel %vm1962_vm10, %v821_v63, 0.0  ;;  %v1347_v9 = vsel %vm1963_vm11, %v821_v63, 0.0  ;;  %vm560_vm1 = vcmp.eq.s32.totalorder %v1055_v37, %v969_v29  ;;  %v1356_v34 = vsel %vm392_vm6, %v821_v63, 0.0 }
  0xe9   :  { %1960 = vst [vmem:[#allocation11_spill] sm:$0xff] %v1332_v0  ;;  %1961 = vst [vmem:[#allocation12_spill] sm:$0xff] %v1337_v7  ;;  %vm1964_vm2 = vcmp.eq.s32.totalorder %v1049_v35, %v965_v27  ;;  %vm1965_vm13 = vcmp.eq.s32.totalorder %v1049_v35, %v967_v28  ;;  %vm1966_vm14 = vcmp.eq.s32.totalorder %v1049_v35, %v969_v29  ;;  %v1393_v0 = vpop.f32.mrf.mxu0  ;;  %v1422_v60 = vsel %vm621_vm8, %v200_v18, 0.0 }
  0xea   :  { %v1361_v10 = vsel %vm1964_vm2, %v821_v63, 0.0  ;;  %v1366_v11 = vsel %vm1965_vm13, %v821_v63, 0.0  ;;  %v1371_v17 = vsel %vm1966_vm14, %v821_v63, 0.0  ;;  %vm1968_vm6 = vcmp.eq.s32.totalorder %v1049_v35, %v971_v30  ;;  %1980 = vst [vmem:[#allocation18_spill] sm:$0xff] %v1422_v60 }
  0xeb   :  { %1967 = vst [vmem:[#allocation13_spill] sm:$0xff] %v1371_v17  ;;  %v1376_v19 = vsel %vm1968_vm6, %v821_v63, 0.0  ;;  %vm1970_vm10 = vcmp.eq.s32.totalorder %v1049_v35, %v973_v31  ;;  %vm1972_vm11 = vcmp.eq.s32.totalorder %v1052_v36, %v959_v24  ;;  %vm1973_vm2 = vcmp.eq.s32.totalorder %v1052_v36, %v961_v25 }
  0xec   :  { %1969 = vst [vmem:[#allocation14_spill] sm:$0xff] %v1376_v19  ;;  %v1381_v20 = vsel %vm1970_vm10, %v821_v63, 0.0  ;;  %v1386_v53 = vsel %vm1972_vm11, %v200_v18, 0.0  ;;  %v1391_v7 = vsel %vm1973_vm2, %v200_v18, 0.0  ;;  %vm561_vm13 = vcmp.eq.s32.totalorder %v1058_v38, %v969_v29 }
  0xed   :  { %1971 = vst [vmem:[#allocation15_spill] sm:$0xff] %v1381_v20  ;;  %vm562_vm14 = vcmp.eq.s32.totalorder %v1061_v39, %v969_v29  ;;  %vm1974_vm6 = vcmp.eq.s32.totalorder %v1052_v36, %v963_v26  ;;  %vm1975_vm10 = vcmp.eq.s32.totalorder %v1052_v36, %v965_v27  ;;  %vm1976_vm11 = vcmp.eq.s32.totalorder %v1052_v36, %v967_v28 }
  0xee   :  { %v1402_v35 = vsel %vm1974_vm6, %v200_v18, 0.0  ;;  %v1407_v63 = vsel %vm1975_vm10, %v200_v18, 0.0  ;;  %v1412_v62 = vsel %vm1976_vm11, %v200_v18, 0.0  ;;  %vm1978_vm2 = vcmp.eq.s32.totalorder %v1052_v36, %v969_v29 }
  0xef   :  { %1977 = vst [vmem:[#allocation16_spill] sm:$0xff] %v1412_v62  ;;  %v1417_v61 = vsel %vm1978_vm2, %v200_v18, 0.0  ;;  %v1427_v59 = vsel %vm678_vm7, %v200_v18, 0.0  ;;  %v291_v58 = vsel %vm275_vm4, %v1283_v40, 0.0  ;;  %v304_v57 = vadd.f32 %v303_v14, %v1082_v45 }
  0xf0   :  { %1979 = vst [vmem:[#allocation17_spill] sm:$0xff] %v1417_v61  ;;  %1981 = vst [vmem:[#allocation19_spill] sm:$0xff] %v1427_v59  ;;  %vm617_vm6 = vcmp.eq.s32.totalorder %v1055_v37, %v971_v30  ;;  %vm1982_vm8 = vcmp.eq.s32.totalorder %v1058_v38, %v959_v24  ;;  %vm1983_vm7 = vcmp.eq.s32.totalorder %v1061_v39, %v959_v24 }
  0xf1   :  { %v292_v20 = vsel %vm1982_vm8, %v1393_v0, 0.0  ;;  %v293_v36 = vsel %vm1983_vm7, %v1253_v16, 0.0  ;;  %vm1984_vm10 = vcmp.eq.s32.totalorder %v1055_v37, %v961_v25  ;;  %v361_v45 = vadd.f32 %v360_v15, %v1087_v46 }
  0xf2   :  { %v348_v18 = vsel %vm1984_vm10, %v1283_v40, 0.0  ;;  %vm618_vm4 = vcmp.eq.s32.totalorder %v1058_v38, %v971_v30  ;;  %v305_v14 = vadd.f32 %v304_v57, %v1184_v1  ;;  %vm1985_vm11 = vcmp.eq.s32.totalorder %v1058_v38, %v961_v25 }
  0xf3   :  { %v349_v59 = vsel %vm1985_vm11, %v1393_v0, 0.0  ;;  %vm1986_vm2 = vcmp.eq.s32.totalorder %v1061_v39, %v961_v25  ;;  %vm1987_vm8 = vcmp.eq.s32.totalorder %v1055_v37, %v963_v26  ;;  %vm619_vm7 = vcmp.eq.s32.totalorder %v1061_v39, %v971_v30 }
  0xf4   :  { %v350_v60 = vsel %vm1986_vm2, %v1253_v16, 0.0  ;;  %v405_v46 = vsel %vm1987_vm8, %v1283_v40, 0.0  ;;  %v362_v1 = vadd.f32 %v361_v45, %v1189_v2  ;;  %v406_v15 = vsel %vm390_vm5, %v1393_v0, 0.0 }
  0xf5   :  { %v407_v57 = vsel %vm391_vm9, %v1253_v16, 0.0  ;;  %v418_v19 = vadd.f32 %v417_v21, %v1106_v49  ;;  %v306_v61 = vadd.f32 %v305_v14, %v291_v58  ;;  %vm1988_vm10 = vcmp.eq.s32.totalorder %v1055_v37, %v965_v27 }
  0xf6   :  { %v462_v17 = vsel %vm1988_vm10, %v1283_v40, 0.0  ;;  %vm1989_vm11 = vcmp.eq.s32.totalorder %v1058_v38, %v965_v27  ;;  %v475_v45 = vadd.f32 %v1277_v22, %v1111_v50  ;;  %vm674_vm5 = vcmp.eq.s32.totalorder %v1055_v37, %v973_v31  ;;  %v1501_v50 = vpop.f32.mrf.mxu1 }
  0xf7   :  { %v463_v2 = vsel %vm1989_vm11, %v1393_v0, 0.0  ;;  %vm675_vm9 = vcmp.eq.s32.totalorder %v1058_v38, %v973_v31  ;;  %v363_v49 = vadd.f32 %v362_v1, %v348_v18  ;;  %v419_v21 = vadd.f32 %v418_v19, %v1202_v3 }
  0xf8   :  { %v464_v58 = vsel %vm448_vm3, %v1253_v16, 0.0  ;;  %v519_v14 = vsel %vm503_vm15, %v1283_v40, 0.0  ;;  %vm676_vm2 = vcmp.eq.s32.totalorder %v1061_v39, %v973_v31  ;;  %v307_v22 = vadd.f32 %v306_v61, %v292_v20 }
  0xf9   :  { %v476_v18 = vadd.f32 %v475_v45, %v1207_v4  ;;  %v520_v3 = vsel %vm504_vm12, %v1393_v0, 0.0  ;;  %v532_v19 = vadd.f32 %v1279_v23, %v1116_v51  ;;  %vm282_vm3 = vcmp.eq.s32.totalorder %v1068_v41, %v959_v24 }
  0xfa   :  { %v364_v1 = vadd.f32 %v363_v49, %v349_v59  ;;  %v420_v62 = vadd.f32 %v419_v21, %v405_v46  ;;  %v521_v61 = vsel %vm505_vm0, %v1253_v16, 0.0  ;;  %v576_v4 = vsel %vm560_vm1, %v1283_v40, 0.0 }
  0xfb   :  { %vm339_vm15 = vcmp.eq.s32.totalorder %v1068_v41, %v961_v25  ;;  %vm396_vm12 = vcmp.eq.s32.totalorder %v1068_v41, %v963_v26  ;;  %v308_v51 = vadd.f32 %v307_v22, %v293_v36  ;;  %v477_v23 = vadd.f32 %v476_v18, %v462_v17 }
  0xfc   :  { %v533_v59 = vadd.f32 %v532_v19, %v1212_v5  ;;  %v589_v20 = vadd.f32 %v1281_v32, %v1121_v52  ;;  %vm453_vm0 = vcmp.eq.s32.totalorder %v1068_v41, %v965_v27  ;;  %vm510_vm8 = vcmp.eq.s32.totalorder %v1068_v41, %v967_v28  ;;  %v1545_v52 = vpop.f32.mrf.mxu1 }
  0xfd   :  { %v365_v46 = vadd.f32 %v364_v1, %v350_v60  ;;  %v421_v45 = vadd.f32 %v420_v62, %v406_v15  ;;  %v577_v49 = vsel %vm561_vm13, %v1393_v0, 0.0  ;;  %v578_v5 = vsel %vm562_vm14, %v1253_v16, 0.0 }
  0xfe   :  { %vm567_vm1 = vcmp.eq.s32.totalorder %v1068_v41, %v969_v29  ;;  %vm624_vm10 = vcmp.eq.s32.totalorder %v1068_v41, %v971_v30  ;;  %v309_v32 = vadd.f32 %v308_v51, %v1342_v8  ;;  %v478_v60 = vadd.f32 %v477_v23, %v463_v2  ;;  %v1581_v22 = vpop.f32.mrf.mxu1 }
  0xff   :  { %v534_v62 = vadd.f32 %v533_v59, %v519_v14  ;;  %v590_v17 = vadd.f32 %v589_v20, %v1217_v6  ;;  %v366_v36 = vadd.f32 %v365_v46, %v1347_v9  ;;  %v422_v15 = vadd.f32 %v421_v45, %v407_v57  ;;  %v1992_v46 = vld [vmem:[#allocation17_spill] sm:$0xff] }
 0x100   :  { %v633_v21 = vsel %vm617_vm6, %v1283_v40, 0.0  ;;  %v646_v8 = vadd.f32 %v1289_v33, %v1134_v54  ;;  %vm394_vm11 = vcmp.eq.s32.totalorder %v1071_v42, %v963_v26  ;;  %vm451_vm13 = vcmp.eq.s32.totalorder %v1071_v42, %v965_v27 }
 0x101   :  { %v479_v6 = vadd.f32 %v478_v60, %v464_v58  ;;  %v535_v2 = vadd.f32 %v534_v62, %v520_v3  ;;  %v591_v14 = vadd.f32 %v590_v17, %v576_v4  ;;  %v634_v9 = vsel %vm618_vm4, %v1393_v0, 0.0  ;;  %v1994_v60 = vld [vmem:[#allocation14_spill] sm:$0xff] }
 0x102   :  { %vm508_vm6 = vcmp.eq.s32.totalorder %v1071_v42, %v967_v28  ;;  %v310_v54 = vadd.f32 %v309_v32, %v1386_v53  ;;  %v423_v33 = vadd.f32 %v422_v15, %v1356_v34  ;;  %v635_v57 = vsel %vm619_vm7, %v1253_v16, 0.0 }
 0x103   :  { %v647_v58 = vadd.f32 %v646_v8, %v1246_v12  ;;  %v367_v18 = vadd.f32 %v366_v36, %v1391_v7  ;;  %v480_v3 = vadd.f32 %v479_v6, %v1361_v10  ;;  %v536_v19 = vadd.f32 %v535_v2, %v521_v61  ;;  %v1997_v2 = vld [vmem:[#allocation18_spill] sm:$0xff] }
 0x104   :  { %v592_v53 = vadd.f32 %v591_v14, %v577_v49  ;;  %v690_v12 = vsel %vm674_vm5, %v1283_v40, 0.0  ;;  %v691_v1 = vsel %vm675_vm9, %v1393_v0, 0.0  ;;  %v703_v7 = vadd.f32 %v1291_v56, %v1139_v55 }
 0x105   :  { %v648_v34 = vadd.f32 %v647_v58, %v633_v21  ;;  %vm286_vm7 = vcmp.eq.s32.totalorder %v1074_v43, %v959_v24  ;;  %vm457_vm5 = vcmp.eq.s32.totalorder %v1074_v43, %v965_v27  ;;  %v424_v37 = vadd.f32 %v423_v33, %v1402_v35 }
 0x106   :  { %v537_v38 = vadd.f32 %v536_v19, %v1366_v11  ;;  %v593_v40 = vadd.f32 %v592_v53, %v578_v5  ;;  %v692_v55 = vsel %vm676_vm2, %v1253_v16, 0.0  ;;  %vm514_vm9 = vcmp.eq.s32.totalorder %v1074_v43, %v967_v28  ;;  %v1625_v16 = vpop.f32.mrf.mxu1  ;;  %v1990_v11 = vld [vmem:[#allocation16_spill] sm:$0xff]  ;;  %v2000_v19 = vld [vmem:[#allocation15_spill] sm:$0xff] }
 0x107   :  { %v481_v56 = vadd.f32 %v480_v3, %v1407_v63  ;;  %v649_v0 = vadd.f32 %v648_v34, %v634_v9  ;;  %v704_v10 = vadd.f32 %v703_v7, %v1251_v13  ;;  %v1623_v39 = vsel %vm282_vm3, %v1501_v50, 0.0  ;;  %v1991_v13 = vld [vmem:[#allocation13_spill] sm:$0xff] }
 0x108   :  { %vm283_vm2 = vcmp.eq.s32.totalorder %v1077_v44, %v959_v24  ;;  %vm284_vm14 = vcmp.eq.s32.totalorder %v1098_v47, %v959_v24  ;;  %v538_v35 = vadd.f32 %v537_v38, %v1990_v11  ;;  %v594_v63 = vadd.f32 %v593_v40, %v1991_v13 }
 0x109   :  { %v1639_v61 = vsel %vm339_vm15, %v1501_v50, 0.0  ;;  %v1645_v4 = vsel %vm396_vm12, %v1501_v50, 0.0  ;;  %vm340_vm3 = vcmp.eq.s32.totalorder %v1077_v44, %v961_v25  ;;  %vm341_vm4 = vcmp.eq.s32.totalorder %v1098_v47, %v961_v25 }
 0x10a   :  { %v650_v51 = vadd.f32 %v649_v0, %v635_v57  ;;  %v705_v23 = vadd.f32 %v704_v10, %v690_v12  ;;  %v1655_v59 = vsel %vm453_vm0, %v1501_v50, 0.0  ;;  %v1661_v20 = vsel %vm510_vm8, %v1501_v50, 0.0 }
 0x10b   :  { %vm342_vm15 = vcmp.eq.s32.totalorder %v1101_v48, %v961_v25  ;;  %v595_v45 = vadd.f32 %v594_v63, %v1992_v46  ;;  %v1672_v49 = vsel %vm567_vm1, %v1501_v50, 0.0  ;;  %v1678_v5 = vsel %vm624_vm10, %v1501_v50, 0.0  ;;  %v2008_v63 = vld [vmem:[#allocation5_spill] sm:$0xff] }
 0x10c   :  { %vm1993_vm0 = vcmp.eq.s32.totalorder %v1068_v41, %v973_v31  ;;  %vm398_vm8 = vcmp.eq.s32.totalorder %v1098_v47, %v963_v26  ;;  %vm454_vm1 = vcmp.eq.s32.totalorder %v1077_v44, %v965_v27  ;;  %v651_v62 = vadd.f32 %v650_v51, %v1994_v60  ;;  %v2009_v60 = vld [vmem:[#allocation6_spill] sm:$0xff] }
 0x10d   :  { %v1684_v32 = vsel %vm1993_vm0, %v1501_v50, 0.0  ;;  %v706_v17 = vadd.f32 %v705_v23, %v691_v1  ;;  %vm1995_vm10 = vcmp.eq.s32.totalorder %v1071_v42, %v959_v24  ;;  %vm1996_vm0 = vcmp.eq.s32.totalorder %v1071_v42, %v961_v25  ;;  %v1701_v50 = vpop.f32.mrf.mxu1 }
 0x10e   :  { %v296_v36 = vsel %vm1995_vm10, %v1545_v52, 0.0  ;;  %v353_v41 = vsel %vm1996_vm0, %v1545_v52, 0.0  ;;  %vm455_vm12 = vcmp.eq.s32.totalorder %v1098_v47, %v965_v27  ;;  %v410_v8 = vsel %vm394_vm11, %v1545_v52, 0.0 }
 0x10f   :  { %v311_v15 = vadd.f32 %v310_v54, %v296_v36  ;;  %v368_v21 = vadd.f32 %v367_v18, %v353_v41  ;;  %v467_v6 = vsel %vm451_vm13, %v1545_v52, 0.0  ;;  %v652_v14 = vadd.f32 %v651_v62, %v1997_v2  ;;  %v1743_v7 = vpop.f32.mrf.mxu1  ;;  %v2011_v41 = vld [vmem:[#allocation7_spill] sm:$0xff] }
 0x110   :  { %v707_v9 = vadd.f32 %v706_v17, %v692_v55  ;;  %v524_v54 = vsel %vm508_vm6, %v1545_v52, 0.0  ;;  %vm1998_vm11 = vcmp.eq.s32.totalorder %v1071_v42, %v969_v29  ;;  %vm512_vm13 = vcmp.eq.s32.totalorder %v1098_v47, %v967_v28 }
 0x111   :  { %v581_v33 = vsel %vm1998_vm11, %v1545_v52, 0.0  ;;  %v425_v57 = vadd.f32 %v424_v37, %v410_v8  ;;  %v482_v58 = vadd.f32 %v481_v56, %v467_v6  ;;  %v539_v18 = vadd.f32 %v538_v35, %v524_v54 }
 0x112   :  { %vm1999_vm0 = vcmp.eq.s32.totalorder %v1071_v42, %v971_v30  ;;  %vm513_vm10 = vcmp.eq.s32.totalorder %v1101_v48, %v967_v28  ;;  %v708_v53 = vadd.f32 %v707_v9, %v2000_v19  ;;  %v596_v34 = vadd.f32 %v595_v45, %v581_v33  ;;  %v2016_v33 = vld [vmem:[#allocation9_spill] sm:$0xff] }
 0x113   :  { %v638_v3 = vsel %vm1999_vm0, %v1545_v52, 0.0  ;;  %vm2001_vm11 = vcmp.eq.s32.totalorder %v1071_v42, %v973_v31  ;;  %v302_v37 = vsel %vm286_vm7, %v1701_v50, 0.0  ;;  %vm2002_vm0 = vcmp.eq.s32.totalorder %v1074_v43, %v961_v25 }
 0x114   :  { %v1737_v12 = vadd.f32 %v652_v14, %v638_v3  ;;  %v695_v1 = vsel %vm2001_vm11, %v1545_v52, 0.0  ;;  %v359_v38 = vsel %vm2002_vm0, %v1701_v50, 0.0  ;;  %vm2003_vm6 = vcmp.eq.s32.totalorder %v1074_v43, %v963_v26  ;;  %v2004_v52 = vld [vmem:[#allocation19_spill] sm:$0xff]  ;;  %v2013_v14 = vld [vmem:[#allocation8_spill] sm:$0xff] }
 0x115   :  { %v416_v40 = vsel %vm2003_vm6, %v1701_v50, 0.0  ;;  %v1761_v42 = vsel %vm457_vm5, %v1701_v50, 0.0  ;;  %vm569_vm11 = vcmp.eq.s32.totalorder %v1098_v47, %v969_v29  ;;  %vm570_vm7 = vcmp.eq.s32.totalorder %v1101_v48, %v969_v29 }
 0x116   :  { %v709_v55 = vadd.f32 %v708_v53, %v2004_v52  ;;  %v1772_v56 = vsel %vm514_vm9, %v1701_v50, 0.0  ;;  %vm2005_vm6 = vcmp.eq.s32.totalorder %v1074_v43, %v969_v29  ;;  %vm2006_vm5 = vcmp.eq.s32.totalorder %v1074_v43, %v971_v30 }
 0x117   :  { %v1778_v0 = vsel %vm2005_vm6, %v1701_v50, 0.0  ;;  %v1784_v10 = vsel %vm2006_vm5, %v1701_v50, 0.0  ;;  %v299_v11 = vsel %vm283_vm2, %v1625_v16, 0.0  ;;  %v300_v35 = vsel %vm284_vm14, %v1743_v7, 0.0 }
 0x118   :  { %vm2007_vm9 = vcmp.eq.s32.totalorder %v1101_v48, %v959_v24  ;;  %v312_v51 = vadd.f32 %v311_v15, %v2008_v63  ;;  %vm625_vm0 = vcmp.eq.s32.totalorder %v1077_v44, %v971_v30  ;;  %v1801_v23 = vadd.f32 %v709_v55, %v695_v1 }
 0x119   :  { %v301_v13 = vsel %vm2007_vm9, %v1581_v22, 0.0  ;;  %v356_v46 = vsel %vm340_vm3, %v1625_v16, 0.0  ;;  %v357_v45 = vsel %vm341_vm4, %v1743_v7, 0.0  ;;  %v369_v24 = vadd.f32 %v368_v21, %v2009_v60 }
 0x11a   :  { %v313_v62 = vadd.f32 %v312_v51, %v1623_v39  ;;  %v358_v17 = vsel %vm342_vm15, %v1581_v22, 0.0  ;;  %vm2010_vm14 = vcmp.eq.s32.totalorder %v1077_v44, %v963_v26  ;;  %v426_v15 = vadd.f32 %v425_v57, %v2011_v41 }
 0x11b   :  { %v413_v36 = vsel %vm2010_vm14, %v1625_v16, 0.0  ;;  %vm626_vm2 = vcmp.eq.s32.totalorder %v1098_v47, %v971_v30  ;;  %v370_v8 = vadd.f32 %v369_v24, %v1639_v61  ;;  %v414_v39 = vsel %vm398_vm8, %v1743_v7, 0.0 }
 0x11c   :  { %vm2012_vm4 = vcmp.eq.s32.totalorder %v1101_v48, %v963_v26  ;;  %v470_v21 = vsel %vm454_vm1, %v1625_v16, 0.0  ;;  %v314_v6 = vadd.f32 %v313_v62, %v299_v11  ;;  %v427_v2 = vadd.f32 %v426_v15, %v1645_v4 }
 0x11d   :  { %v415_v25 = vsel %vm2012_vm4, %v1581_v22, 0.0  ;;  %v471_v61 = vsel %vm455_vm12, %v1743_v7, 0.0  ;;  %v483_v9 = vadd.f32 %v482_v58, %v2013_v14  ;;  %vm627_vm3 = vcmp.eq.s32.totalorder %v1101_v48, %v971_v30 }
 0x11e   :  { %v371_v26 = vadd.f32 %v370_v8, %v356_v46  ;;  %vm2014_vm15 = vcmp.eq.s32.totalorder %v1101_v48, %v965_v27  ;;  %vm2015_vm8 = vcmp.eq.s32.totalorder %v1077_v44, %v967_v28  ;;  %v540_v57 = vadd.f32 %v539_v18, %v2016_v33 }
 0x11f   :  { %v472_v54 = vsel %vm2014_vm15, %v1581_v22, 0.0  ;;  %v527_v4 = vsel %vm2015_vm8, %v1625_v16, 0.0  ;;  %v315_v3 = vadd.f32 %v314_v6, %v300_v35  ;;  %v428_v19 = vadd.f32 %v427_v2, %v413_v36  ;;  %v2018_v35 = vld [vmem:[#allocation10_spill] sm:$0xff] }
 0x120   :  { %v484_v58 = vadd.f32 %v483_v9, %v1655_v59  ;;  %v528_v53 = vsel %vm512_vm13, %v1743_v7, 0.0  ;;  %vm682_vm12 = vcmp.eq.s32.totalorder %v1077_v44, %v973_v31  ;;  %v372_v27 = vadd.f32 %v371_v26, %v357_v45 }
 0x121   :  { %v529_v1 = vsel %vm513_vm10, %v1581_v22, 0.0  ;;  %v541_v18 = vadd.f32 %v540_v57, %v1661_v20  ;;  %vm2017_vm1 = vcmp.eq.s32.totalorder %v1077_v44, %v969_v29  ;;  %v316_v52 = vadd.f32 %v315_v3, %v301_v13 }
 0x122   :  { %v584_v59 = vsel %vm2017_vm1, %v1625_v16, 0.0  ;;  %v429_v55 = vadd.f32 %v428_v19, %v414_v39  ;;  %v485_v11 = vadd.f32 %v484_v58, %v470_v21  ;;  %v597_v63 = vadd.f32 %v596_v34, %v2018_v35 }
 0x123   :  { %v373_v51 = vadd.f32 %v372_v27, %v358_v17  ;;  %v542_v46 = vadd.f32 %v541_v18, %v527_v4  ;;  %v585_v28 = vsel %vm569_vm11, %v1743_v7, 0.0  ;;  %v586_v20 = vsel %vm570_vm7, %v1581_v22, 0.0  ;;  %v2019_v17 = vld [vmem:[#allocation11_spill] sm:$0xff]  ;;  %v2020_v18 = vld [vmem:[#allocation12_spill] sm:$0xff] }
 0x124   :  { %v317_v45 = vadd.f32 %v316_v52, %v302_v37  ;;  %v430_v60 = vadd.f32 %v429_v55, %v415_v25  ;;  %v486_v24 = vadd.f32 %v485_v11, %v471_v61  ;;  %v598_v13 = vadd.f32 %v597_v63, %v1672_v49 }
 0x125   :  { %v374_v62 = vadd.f32 %v373_v51, %v359_v38  ;;  %v543_v36 = vadd.f32 %v542_v46, %v528_v53  ;;  %v641_v34 = vsel %vm625_vm0, %v1625_v16, 0.0  ;;  %v654_v41 = vadd.f32 %v1737_v12, %v2019_v17 }
 0x126   :  { %v318_v15 = vrot.slane %v317_v45, 4  ;;  %v431_v8 = vadd.f32 %v430_v60, %v416_v40  ;;  %v487_v39 = vadd.f32 %v486_v24, %v472_v54  ;;  %v599_v29 = vadd.f32 %v598_v13, %v584_v59 }
 0x127   :  { %v375_v21 = vrot.slane %v374_v62, 4  ;;  %v544_v37 = vadd.f32 %v543_v36, %v529_v1  ;;  %v642_v49 = vsel %vm626_vm2, %v1743_v7, 0.0  ;;  %v655_v38 = vadd.f32 %v654_v41, %v1678_v5 }
 0x128   :  { %vm683_vm10 = vcmp.eq.s32.totalorder %v1098_v47, %v973_v31  ;;  %v319_v25 = vadd.f32 %v318_v15, %v317_v45  ;;  %v432_v6 = vrot.slane %v431_v8, 4  ;;  %v488_v12 = vadd.f32 %v487_v39, %v1761_v42 }
 0x129   :  { %v600_v2 = vadd.f32 %v599_v29, %v585_v28  ;;  %vm724_vm13 = vcmask 1040384   ;;  %v376_v40 = vadd.f32 %v375_v21, %v374_v62  ;;  %v545_v61 = vadd.f32 %v544_v37, %v1772_v56 }
 0x12a   :  { %v643_v14 = vsel %vm627_vm3, %v1581_v22, 0.0  ;;  %v656_v9 = vadd.f32 %v655_v38, %v641_v34  ;;  %vm684_vm11 = vcmp.eq.s32.totalorder %v1101_v48, %v973_v31  ;;  %v320_v5 = vrot.slane %v319_v25, 2 }
 0x12b   :  { %v433_v26 = vadd.f32 %v432_v6, %v431_v8  ;;  %v489_v54 = vrot.slane %v488_v12, 4  ;;  %v601_v4 = vadd.f32 %v600_v2, %v586_v20  ;;  %v377_v33 = vrot.slane %v376_v40, 2 }
 0x12c   :  { %v546_v42 = vrot.slane %v545_v61, 4  ;;  %v657_v57 = vadd.f32 %v656_v9, %v642_v49  ;;  %v698_v56 = vsel %vm682_vm12, %v1625_v16, 0.0  ;;  %vm685_vm7 = vcmp.eq.s32.totalorder %v1074_v43, %v973_v31 }
 0x12d   :  { %v321_v30 = vadd.f32 %v320_v5, %v319_v25  ;;  %v434_v3 = vrot.slane %v433_v26, 2  ;;  %v490_v19 = vadd.f32 %v489_v54, %v488_v12  ;;  %v602_v58 = vadd.f32 %v601_v4, %v1778_v0 }
 0x12e   :  { %v378_v53 = vadd.f32 %v377_v33, %v376_v40  ;;  %v547_v27 = vadd.f32 %v546_v42, %v545_v61  ;;  %v658_v1 = vadd.f32 %v657_v57, %v643_v14  ;;  %v711_v59 = vadd.f32 %v1801_v23, %v2020_v18 }
 0x12f   :  { %v322_v52 = vrot.slane %v321_v30, 1  ;;  %v435_v55 = vadd.f32 %v434_v3, %v433_v26  ;;  %v491_v11 = vrot.slane %v490_v19, 2  ;;  %v603_v35 = vrot.slane %v602_v58, 4 }
 0x130   :  { %v379_v44 = vrot.slane %v378_v53, 1  ;;  %v659_v16 = vadd.f32 %v658_v1, %v1784_v10  ;;  %v712_v63 = vadd.f32 %v711_v59, %v1684_v32  ;;  %v548_v51 = vrot.slane %v547_v27, 2 }
 0x131   :  { %v323_v46 = vadd.f32 %v322_v52, %v321_v30  ;;  %v436_v28 = vrot.slane %v435_v55, 1  ;;  %v492_v20 = vadd.f32 %v491_v11, %v490_v19  ;;  %v604_v0 = vadd.f32 %v603_v35, %v602_v58 }
 0x132   :  { %v713_v45 = vadd.f32 %v712_v63, %v698_v56  ;;  %v380_v60 = vadd.f32 %v379_v44, %v378_v53  ;;  %v660_v24 = vrot.slane %v659_v16, 4  ;;  %vm726_vm6 = vcmask 1041408  }
 0x133   :  { %v699_v23 = vsel %vm683_vm10, %v1743_v7, 0.0  ;;  %v437_v13 = vadd.f32 %v436_v28, %v435_v55  ;;  %v549_v62 = vadd.f32 %v548_v51, %v547_v27  ;;  %v605_v36 = vrot.slane %v604_v0, 2 }
 0x134   :  { %v714_v10 = vadd.f32 %v713_v45, %v699_v23  ;;  %v493_v34 = vrot.slane %v492_v20, 1  ;;  %v661_v32 = vadd.f32 %v660_v24, %v659_v16  ;;  %v725_v17 = vsel %vm724_vm13, %v323_v46, %v380_v60 }
 0x135   :  { %v700_v41 = vsel %vm684_vm11, %v1581_v22, 0.0  ;;  %v606_v8 = vadd.f32 %v605_v36, %v604_v0  ;;  %v550_v29 = vrot.slane %v549_v62, 1  ;;  %v701_v47 = vsel %vm685_vm7, %v1701_v50, 0.0 }
 0x136   :  { %v715_v15 = vadd.f32 %v714_v10, %v700_v41  ;;  %v662_v39 = vrot.slane %v661_v32, 2  ;;  %v727_v7 = vsel %vm726_vm6, %v725_v17, %v437_v13  ;;  %vm728_vm5 = vcmask 1042432  }
 0x137   :  { %v494_v21 = vadd.f32 %v493_v34, %v492_v20  ;;  %v607_v38 = vrot.slane %v606_v8, 1  ;;  %vm730_vm9 = vcmask 1043456   ;;  %v551_v48 = vadd.f32 %v550_v29, %v549_v62 }
 0x138   :  { %v716_v37 = vadd.f32 %v715_v15, %v701_v47  ;;  %v663_v49 = vadd.f32 %v662_v39, %v661_v32  ;;  %vm732_vm0 = vcmask 1044480   ;;  %vm734_vm14 = vcmask 1045504  }
 0x139   :  { %v729_v6 = vsel %vm728_vm5, %v727_v7, %v494_v21  ;;  %v608_v40 = vadd.f32 %v607_v38, %v606_v8  ;;  %vm736_vm2 = vcmask 1046528  }
 0x13a   :  { %v717_v25 = vrot.slane %v716_v37, 4  ;;  %v664_v12 = vrot.slane %v663_v49, 1  ;;  %v731_v2 = vsel %vm730_vm9, %v729_v6, %v551_v48 }
 0x13b   :  { %v733_v9 = vsel %vm732_vm0, %v731_v2, %v608_v40 }
 0x13c   :  { %v718_v22 = vadd.f32 %v717_v25, %v716_v37  ;;  %v665_v31 = vadd.f32 %v664_v12, %v663_v49 }
 0x13e   :  { %v719_v61 = vrot.slane %v718_v22, 2  ;;  %v735_v50 = vsel %vm734_vm14, %v733_v9, %v665_v31 }
 0x140   :  { %v720_v14 = vadd.f32 %v719_v61, %v718_v22 }
 0x142   :  { %v721_v43 = vrot.slane %v720_v14, 1 }
 0x144   :  { %v722_v5 = vadd.f32 %v721_v43, %v720_v14 }
 0x146   :  { %v737_v26 = vsel %vm736_vm2, %v735_v50, %v722_v5 }
 0x147   :  { %v745_v54 = vand.u32 2147483647, %v737_v26  ;;  %v744_v27 = vmin.f32 %v737_v26, 0.0 }
 0x149   :  { %v746_v4 = vsub.f32 0.0, %v745_v54 }
 0x14b   :  { %v747_v33 = vmul.f32 1.442695, %v746_v4 }
 0x14d   :  { %852 = vpow2.f32 %v747_v33 }
 0x15a   :  { %v853_v42 = vpop.eup %852 }
 0x15b   :  { %v749_v57 = vadd.f32 1.0, %v853_v42  ;;  %v752_v56 = vmul.f32 -0.5, %v853_v42  ;;  %v755_v3 = vand.u32 2147483647, %v853_v42 }
 0x15d   :  { %854 = vlog2.f32 %v749_v57  ;;  %v753_v30 = vadd.f32 1.0, %v752_v56  ;;  %vm756_vm4 = vcmp.lt.f32.partialorder %v755_v3, 0.0004427343 }
 0x15f   :  { %v754_v53 = vmul.f32 %v853_v42, %v753_v30 }
 0x16a   :  { %v855_v19 = vpop.eup %854 }
 0x16b   :  { %v751_v58 = vmul.f32 0.6931472, %v855_v19 }
 0x16d   :  { %v757_v1 = vsel %vm756_vm4, %v754_v53, %v751_v58 }
 0x16e   :  { %v758_v18 = vsub.f32 %v744_v27, %v757_v1 }
 0x170   :  { %759 = vst [vmem:[#allocation2] sm:$0xff] %v758_v18 }
 0x171   :  { %867 = shalt.err (!%p864_p4)
}
 0x172   :  { %769 = dma.vmem_to_hbm [thread:$0]  %s767_s2, 128, %s1931_s3, [#allocation3]  }
 0x173   :  { %876 = dma.done.wait [#allocation3], 128  }
 0x174   :  { %877 = vsyncadd [#allocation3], 4294967168 }
 0x175   :  { %773 = vsyncpa [#allocation3], 1 }

</bundles_post_ra>
